<compile_context>
chip_gen: v6e
topology: v6e:2x2x1
jax: 0.10.0
libtpu: 0.0.40
codegen_flags: <defaults>
</compile_context>

<pallas_src>
import functools
import math

import jax
import jax.numpy as jnp
from jax import lax
from jax.experimental import pallas as pl
from jax.experimental.pallas import tpu as pltpu


def _round_up(x, m):
    return (x + m - 1) // m * m


def make_positional_encoding_table(max_len, d_model):
    """Deterministically build the `pe` buffer exactly as the PyTorch __init__ does."""
    position = jnp.arange(max_len, dtype=jnp.float32)[:, None]             # [max_len, 1]
    div_term = jnp.exp(
        jnp.arange(0, d_model, 2, dtype=jnp.float32) * (-math.log(10000.0) / d_model)
    )                                                                       # [d_model//2]
    angles = position * div_term                                            # [max_len, d_model//2]
    pe = jnp.zeros((max_len, d_model), jnp.float32)
    pe = pe.at[:, 0::2].set(jnp.sin(angles))
    pe = pe.at[:, 1::2].set(jnp.cos(angles))
    return pe[:, None, :]                                                   # [max_len, 1, d_model] fp32


def _add_pe_kernel(x_ref, pe_ref, o_ref, *, scale):
    # x_ref : (ts, B, D) input tile
    # pe_ref: (ts, D)    fp32 positional-encoding tile (dense; no sublane padding)
    # o_ref : (ts, B, D) output tile
    x = x_ref[...].astype(jnp.float32)
    if scale is not None:                     # optional fused embedding scale (static)
        x = x * jnp.float32(scale)
    pe = lax.broadcast_in_dim(pe_ref[...], x.shape, (0, 2))   # broadcast over batch (VPU)
    o_ref[...] = (x + pe).astype(o_ref.dtype)
    # TODO(synk): training-mode dropout would be fused here (pltpu.prng_seed +
    #             pltpu.prng_random_bits mask); eval-mode dropout is identity.


def _tpu_budget():
    """Generation-aware (tile_byte_target, vmem_limit_cap, two_tensorcores)."""
    vmem_cap = 64 << 20                       # conservative fallback (v7x-like)
    try:
        vmem_cap = int(getattr(pltpu.get_tpu_info(), "vmem_capacity_bytes", vmem_cap))
    except Exception:
        pass
    two_cores = vmem_cap < (100 << 20)        # v7x: 64 MiB/TC, 2 TCs; v5e/v6e: 128 MiB, 1 TC
    tile_target = (4 << 20) if two_cores else (8 << 20)
    vmem_limit_cap = min((vmem_cap * 3) // 4, 96 << 20)   # 48 MiB on v7x, 96 MiB on v5e/v6e
    return tile_target, vmem_limit_cap, two_cores


def _choose_seq_tile(S, B, D, itemsize, tile_target, two_cores):
    """Pick seq_tile (multiple of 8) so one (seq_tile, B, D) x-tile is ~tile_target bytes."""
    sub = 8 * max(1, 4 // itemsize)                       # sublane packing: 8 f32, 16 bf16, 32 i8
    row_bytes = _round_up(B, sub) * _round_up(D, 128) * itemsize
    tile = max(8, (tile_target // row_bytes) // 8 * 8)
    tile = min(tile, _round_up(S, 8))
    if two_cores and S > 8:
        # keep >= 2 grid steps so the "parallel" seq axis can shard across both TCs,
        # and prefer an even step count so the megacore split stays balanced.
        tile = min(tile, _round_up(pl.cdiv(S, 2), 8))
        steps = pl.cdiv(S, tile)
        if steps > 1 and steps % 2 == 1:
            tile = _round_up(pl.cdiv(S, steps + 1), 8)
    return int(max(8, tile))


def positional_encoding_forward(x, pe, *, seq_tile=None, scale=None, donate_x=False):
    """x: [S, B, D]; pe: [max_len, 1, D] (or [max_len, D]) fp32 table.

    Returns x (* scale) + pe[:S], computed in fp32 and cast to x.dtype
    (eval-mode dropout = identity).
    """
    S, B, D = x.shape
    max_len = pe.shape[0]
    assert max_len >= S, "sequence longer than the positional-encoding table"
    pe2 = pe.reshape(max_len, -1).astype(jnp.float32)      # dense [max_len, D], keep fp32
    assert pe2.shape[1] == D

    itemsize = jnp.dtype(x.dtype).itemsize
    tile_target, vmem_limit_cap, two_cores = _tpu_budget()
    if seq_tile is None:
        seq_tile = _choose_seq_tile(S, B, D, itemsize, tile_target, two_cores)
    # pe block's second-minor dim must be tiling-aligned -> keep seq_tile a multiple of 8.
    seq_tile = min(_round_up(max(1, int(seq_tile)), 8), _round_up(S, 8))

    grid = (pl.cdiv(S, seq_tile),)            # masked ragged tail; no divisibility requirement

    # Explicit VMEM budget: x & out double-buffered, pe double-buffered, fp32 temporaries,
    # plus headroom; clamped to the generation-aware cap.
    sub = 8 * max(1, 4 // itemsize)
    x_tile_bytes = seq_tile * _round_up(B, sub) * _round_up(D, 128) * itemsize
    f32_tile_bytes = seq_tile * _round_up(B, 8) * _round_up(D, 128) * 4
    pe_tile_bytes = seq_tile * _round_up(D, 128) * 4
    vmem_limit = int(
        min(
            max(4 * x_tile_bytes + 2 * pe_tile_bytes + 3 * f32_tile_bytes + (4 << 20), 16 << 20),
            vmem_limit_cap,
        )
    )

    cost = pl.CostEstimate(
        flops=S * B * D,
        transcendentals=0,
        bytes_accessed=2 * S * B * D * itemsize + S * D * 4,
    )

    kernel = functools.partial(_add_pe_kernel, scale=scale)
    return pl.pallas_call(
        kernel,
        out_shape=jax.ShapeDtypeStruct((S, B, D), x.dtype),
        grid=grid,
        in_specs=[
            pl.BlockSpec((seq_tile, B, D), lambda i: (i, 0, 0)),
            pl.BlockSpec((seq_tile, D), lambda i: (i, 0)),   # dense 2-D pe tile, bounded to first S rows
        ],
        out_specs=pl.BlockSpec((seq_tile, B, D), lambda i: (i, 0, 0)),
        compiler_params=pltpu.CompilerParams(
            dimension_semantics=("parallel",),
            vmem_limit_bytes=vmem_limit,
        ),
        cost_estimate=cost,
        input_output_aliases={0: 0} if donate_x else {},
    )(x, pe2)


if __name__ == "__main__":
    # Small shapes consistent with the module's forward contract: [x_len, batch, emb].
    seq_len, batch, d_model = 8, 2, 32
    max_len = 64  # semantics identical to max_len=5000, just a smaller table

    key = jax.random.PRNGKey(0)
    x = jax.random.normal(key, (seq_len, batch, d_model), dtype=jnp.float32)
    pe = make_positional_encoding_table(max_len, d_model)   # [max_len, 1, d_model] fp32

    out = jax.block_until_ready(positional_encoding_forward(x, pe))
    ref = x + pe[:seq_len]
    assert out.shape == (seq_len, batch, d_model)
    assert jnp.allclose(out, ref, atol=1e-6, rtol=1e-6), "mismatch vs reference"

    # Multi-step grid with a masked ragged tail (S not divisible by seq_tile).
    s2 = 20
    x2 = jax.random.normal(jax.random.PRNGKey(1), (s2, batch, d_model), dtype=jnp.float32)
    out2 = jax.block_until_ready(positional_encoding_forward(x2, pe, seq_tile=8))
    assert jnp.allclose(out2, x2 + pe[:s2], atol=1e-6, rtol=1e-6), "ragged-tail mismatch"

    # bf16 input: fp32 pe, fp32 accumulate, cast on store.
    xb = x.astype(jnp.bfloat16)
    outb = jax.block_until_ready(positional_encoding_forward(xb, pe))
    refb = (xb.astype(jnp.float32) + pe[:seq_len]).astype(jnp.bfloat16)
    assert jnp.allclose(outb.astype(jnp.float32), refb.astype(jnp.float32),
                        atol=1e-2, rtol=1e-2), "bf16 mismatch"

    print("KERNEL_OK")
</pallas_src>

<mosaic_0001>
module attributes {stable_mosaic.version = 11 : i64} {
  func.func @_add_pe_kernel(%arg0: i32, %arg1: memref<8x2x32xf32, #tpu.memory_space<vmem>>, %arg2: memref<8x32xf32, #tpu.memory_space<vmem>>, %arg3: memref<8x2x32xf32, #tpu.memory_space<vmem>>) attributes {dimension_semantics = [#tpu.dimension_semantics<parallel>], iteration_bounds = array<i64: 1>, scalar_prefetch = 0 : i64, scratch_operands = 0 : i64, tpu.core_type = #tpu.core_type<tc>, window_params = [{transform_indices = @transform_0, window_bounds = array<i64: 8, 2, 32>}, {transform_indices = @transform_1, window_bounds = array<i64: 8, 32>}, {transform_indices = @transform_2, window_bounds = array<i64: 8, 2, 32>}]} {
    %c0 = arith.constant 0 : index
    %c0_0 = arith.constant 0 : index
    %c0_1 = arith.constant 0 : index
    %0 = vector.load %arg1[%c0, %c0_0, %c0_1] : memref<8x2x32xf32, #tpu.memory_space<vmem>>, vector<8x2x32xf32>
    %c0_2 = arith.constant 0 : index
    %c0_3 = arith.constant 0 : index
    %1 = vector.load %arg2[%c0_2, %c0_3] : memref<8x32xf32, #tpu.memory_space<vmem>>, vector<8x32xf32>
    %2 = vector.shape_cast %1 : vector<8x32xf32> to vector<8x1x32xf32>
    %3 = vector.broadcast %2 : vector<8x1x32xf32> to vector<8x2x32xf32>
    %4 = arith.addf %0, %3 : vector<8x2x32xf32>
    %c0_4 = arith.constant 0 : index
    %c0_5 = arith.constant 0 : index
    %c0_6 = arith.constant 0 : index
    %5 = vector.load %arg3[%c0_4, %c0_5, %c0_6] : memref<8x2x32xf32, #tpu.memory_space<vmem>>, vector<8x2x32xf32>
    tpu.vector_store %arg3[%c0_4, %c0_5, %c0_6], %4 {strides = array<i32>} : memref<8x2x32xf32, #tpu.memory_space<vmem>>, vector<8x2x32xf32>,
    return
  }
  func.func @transform_0(%arg0: i32) -> (i32, i32, i32) {
    %c0_i32 = arith.constant 0 : i32
    %c0_i32_0 = arith.constant 0 : i32
    %c0_i32_1 = arith.constant 0 : i32
    return %arg0, %c0_i32, %c0_i32_0 : i32, i32, i32
  }
  func.func @transform_1(%arg0: i32) -> (i32, i32) {
    %c0_i32 = arith.constant 0 : i32
    %c0_i32_0 = arith.constant 0 : i32
    return %arg0, %c0_i32 : i32, i32
  }
  func.func @transform_2(%arg0: i32) -> (i32, i32, i32) {
    %c0_i32 = arith.constant 0 : i32
    %c0_i32_0 = arith.constant 0 : i32
    %c0_i32_1 = arith.constant 0 : i32
    return %arg0, %c0_i32, %c0_i32_0 : i32, i32, i32
  }
}

</mosaic_0001>

<bundles_post_ra>
// kernel: tpu_custom_call.1
= control target key start
LH: loop header
LB: loop body
LE: loop exit
PB: predicated region body
PF: predicated region fallthrough
CT: control target
= control target key end

     0   :  { %v26_v1 = vlaneseq  ;;  %v170_v2 = vmov 1966171168   ;;  %s227_s0 = inlined_call_operand.vmem [shape: f32[8,2,32], index: 0, kind: input, shape index: {}]   ;;  %s228_s1 = inlined_call_operand.vmem [shape: f32[64,32], index: 1, kind: input, shape index: {}]   ;;  %s229_s2 = inlined_call_operand.hbm [shape: f32[8,2,32], index: 2, kind: output, shape index: {}]  }
   0x1   :  { %v20_v0 = vld [vmem:[%s228_s1] sm:$0xff]  ;;  %v24_v3 = vunpack.c.l.s4 %v170_v2 }
   0x2   :  { %v27_v4 = vshrl.u32 %v26_v1, 7  ;;  %v22_v6 = vcombine.high %v20_v0, %v20_v0 }
   0x3   :  { %v25_v5 = vunpack.c.0.s8 %v24_v3 }
   0x4   :  { %7 = vsyncpa [#allocation3], 0  ;;  %v73_v9 = vsub.s32 0, %v27_v4  ;;  %v12_v15 = vld [vmem:[%s227_s0] sm:$0x3]  ;;  %vm119_vm0 = vcmask 254976  }
   0x5   :  { %v28_v7 = vsub.s32 %v25_v5, %v27_v4  ;;  %v16_v19 = vld [vmem:[%s227_s0 + $0x8] sm:$0x3]  ;;  %v13_v21 = vld [vmem:[%s227_s0 + $0x2] sm:$0x3]  ;;  %v14_v22 = vld [vmem:[%s227_s0 + $0x4] sm:$0x3] }
   0x6   :  { %v17_v29 = vld [vmem:[%s227_s0 + $0xa] sm:$0x3]  ;;  %v18_v30 = vld [vmem:[%s227_s0 + $0xc] sm:$0x3]  ;;  %v15_v31 = vld [vmem:[%s227_s0 + $0x6] sm:$0x3] }
   0x7   :  { %v29_v8 = vrot.slane %v20_v0, %v28_v7  ;;  %v36_v10 = vrot.slane %v22_v6, %v28_v7  ;;  %v19_v39 = vld [vmem:[%s227_s0 + $0xe] sm:$0x3]  ;;  %s171_s26 = smov [#allocation2]  }
   0x8   :  { %s133_s27 = sshll.u32 %s171_s26, 4  ;;  %s134_s27 = int_to_ptr.vmem [resolvable:$true] %s133_s27 }
   0x9   :  { %v45_v11 = vrot.slane %v29_v8, %v28_v7  ;;  %v37_v12 = vcombine.high %v29_v8, %v29_v8  ;;  %v52_v13 = vrot.slane %v36_v10, %v28_v7  ;;  %v38_v14 = vcombine.high %v36_v10, %v36_v10  ;;  %s148_s0 = scalar_lea.vmem %s134_s27, 256  ;;  %p153_p1 = scmp.lt.s32.totalorder %s134_s27, %s134_s27 }
   0xa   :  { %p149_p0 = scmp.ne.s32.totalorder %s134_s27, %s148_s0  ;;  %p154_p2 = scmp.lt.s32.totalorder %s148_s0, %s148_s0 }
   0xb   :  { %v74_v16 = vrot.slane %v45_v11, %v73_v9  ;;  %v59_v17 = vrot.slane %v37_v12, %v28_v7  ;;  %v67_v18 = vcombine.high %v45_v11, %v45_v11  ;;  %v90_v20 = vrot.slane %v52_v13, %v73_v9 }
   0xc   :  { %v66_v23 = vrot.slane %v38_v14, %v28_v7  ;;  %v68_v24 = vcombine.high %v52_v13, %v52_v13  ;;  %p155_p3 = por %p154_p2, %p153_p1 }
   0xd   :  { %v111_v25 = vadd.f32 %v74_v16, %v12_v15  ;;  %v78_v26 = vrot.slane %v59_v17, %v73_v9  ;;  %v82_v27 = vrot.slane %v67_v18, %v73_v9  ;;  %v69_v28 = vcombine.high %v59_v17, %v59_v17 }
   0xe   :  { %v115_v32 = vadd.f32 %v90_v20, %v16_v19  ;;  %v94_v33 = vrot.slane %v66_v23, %v73_v9  ;;  %v98_v34 = vrot.slane %v68_v24, %v73_v9  ;;  %v70_v35 = vcombine.high %v66_v23, %v66_v23  ;;  %p156_p4 = pnand %p155_p3, %p149_p0 }
   0xf   :  { %120 = vst.msk [vmem:[#allocation2] sm:$0x3] %vm119_vm0, %v111_v25  ;;  %v112_v36 = vadd.f32 %v78_v26, %v13_v21  ;;  %v113_v37 = vadd.f32 %v82_v27, %v14_v22  ;;  %v86_v38 = vrot.slane %v69_v28, %v73_v9 }
  0x10   :  { %124 = vst.msk [vmem:[#allocation2 + $0x8] sm:$0x3] %vm119_vm0, %v115_v32  ;;  %v116_v40 = vadd.f32 %v94_v33, %v17_v29  ;;  %v117_v41 = vadd.f32 %v98_v34, %v18_v30  ;;  %v102_v42 = vrot.slane %v70_v35, %v73_v9 }
  0x11   :  { %121 = vst.msk [vmem:[#allocation2 + $0x2] sm:$0x3] %vm119_vm0, %v112_v36  ;;  %122 = vst.msk [vmem:[#allocation2 + $0x4] sm:$0x3] %vm119_vm0, %v113_v37  ;;  %v114_v43 = vadd.f32 %v86_v38, %v15_v31 }
  0x12   :  { %125 = vst.msk [vmem:[#allocation2 + $0xa] sm:$0x3] %vm119_vm0, %v116_v40  ;;  %126 = vst.msk [vmem:[#allocation2 + $0xc] sm:$0x3] %vm119_vm0, %v117_v41  ;;  %v118_v44 = vadd.f32 %v102_v42, %v19_v39 }
  0x13   :  { %123 = vst.msk [vmem:[#allocation2 + $0x6] sm:$0x3] %vm119_vm0, %v114_v43 }
  0x14   :  { %127 = vst.msk [vmem:[#allocation2 + $0xe] sm:$0x3] %vm119_vm0, %v118_v44 }
  0x15   :  { %159 = shalt.err (!%p156_p4)
}
  0x16   :  { %s172_s28 = smov 32   ;;  %s173_s29 = smov 2  }
  0x17   :  { %139 = dma.vmem_to_hbm [thread:$0]  %s134_s27, 256, %s229_s2, [#allocation3], %s172_s28, %s172_s28, %s173_s29  }
  0x18   :  { %168 = dma.done.wait [#allocation3], 256  }
  0x19   :  { %169 = vsyncadd [#allocation3], 4294967040 }
  0x1a   :  { %143 = vsyncpa [#allocation3], 1 }

</bundles_post_ra>
